<compile_context>
chip_gen: v7x
topology: tpu7x:2x2x1
jax: 0.10.0
libtpu: 0.0.40
codegen_flags: <defaults>
</compile_context>

<pallas_src>
import jax
import jax.numpy as jnp
from jax.experimental import pallas as pl
from jax.experimental.pallas import tpu as pltpu


def _round_up(n, m):
    return ((n + m - 1) // m) * m


def _ortho_kernel(x_ref, c_ref, o_ref):
    """o = x - x @ C.   x tile: (tm, D) native dtype; C: (D, D) bf16, VMEM resident."""
    x = x_ref[...]
    corr = jnp.dot(x.astype(jnp.bfloat16), c_ref[...],
                   preferred_element_type=jnp.float32)          # (tm, D) f32 on the MXU
    o_ref[...] = (x.astype(jnp.float32) - corr).astype(o_ref.dtype)   # f32 epilogue on VPU


def embedding_orthogonalizer(x, bases, *, tm=1024):
    """x: (..., D), bases: (K, D) -> (..., D). Same math as the torch module."""
    K, D = bases.shape

    # ---- tiny parameter setup in plain JAX (K x K system only) ----
    # TODO(synk): dense inverse/solve has no Pallas primitive; the K x K system is
    # solved once in JAX (a jittered Cholesky / lstsq would be more robust for
    # near-dependent bases; solve() matches torch.inverse semantics/cost).
    V = bases.T.astype(jnp.float32)                             # (D, K)
    W = jnp.linalg.solve(V.T @ V, V.T)                          # (K, D)
    C = (V @ W).astype(jnp.bfloat16)                            # (D, D) correction, 1 bf16 rounding

    orig_shape = x.shape
    xf = x.reshape(-1, D)                                       # native dtype, no extra HBM pass
    M = xf.shape[0]

    # Row tile: multiple of 8 sublanes, clamped near the row count. No padding of x:
    # Pallas masks the ragged last block. D is assumed a multiple of 128 (module
    # default 768 qualifies); otherwise the output stores become lane-masked.
    tm_eff = min(_round_up(tm, 8), _round_up(M, 8))
    grid = (pl.cdiv(M, tm_eff),)

    out = pl.pallas_call(
        _ortho_kernel,
        out_shape=jax.ShapeDtypeStruct((M, D), xf.dtype),
        grid=grid,
        in_specs=[
            pl.BlockSpec((tm_eff, D), lambda i: (i, 0)),        # x row tile (streamed)
            pl.BlockSpec((D, D), lambda i: (0, 0)),             # C (resident, ~D*D*2 bytes)
        ],
        out_specs=pl.BlockSpec((tm_eff, D), lambda i: (i, 0)),
        compiler_params=pltpu.CompilerParams(
            dimension_semantics=("parallel",),                  # megacore-shardable row axis
            vmem_limit_bytes=32 * 1024 * 1024),
        # TODO(synk): with matching shape/dtype, input_output_aliases={0: 0} on a
        # donated x would reuse its HBM buffer (footprint win only, not bandwidth).
    )(xf, C)

    return out.reshape(orig_shape)


def _reference(x, bases):
    V = bases.T.astype(jnp.float32)
    P = jnp.eye(V.shape[0], dtype=jnp.float32) - V @ jnp.linalg.inv(V.T @ V) @ V.T
    return x.astype(jnp.float32) @ P


if __name__ == "__main__":
    key = jax.random.PRNGKey(0)
    kb, kx = jax.random.split(key)

    embed_dim, num_bases = 128, 8           # small shapes consistent with the module
    batch, seq = 2, 8

    bases = jax.random.normal(kb, (num_bases, embed_dim), dtype=jnp.float32)
    x = jax.random.normal(kx, (batch, seq, embed_dim), dtype=jnp.float32)

    out = jax.block_until_ready(embedding_orthogonalizer(x, bases))
    ref = _reference(x, bases)

    assert out.shape == x.shape and out.dtype == x.dtype
    # bf16 MXU operand for the rank-K correction with f32 accumulation/epilogue
    # -> slightly relaxed tolerance vs the all-f32 reference.
    assert jnp.allclose(out, ref, atol=2e-2, rtol=2e-2), "mismatch vs reference"

    print("KERNEL_OK")
</pallas_src>

<mosaic_0001>
module attributes {stable_mosaic.version = 11 : i64} {
  func.func @_ortho_kernel(%arg0: i32, %arg1: memref<16x128xf32, #tpu.memory_space<vmem>>, %arg2: memref<128x128xbf16, #tpu.memory_space<vmem>>, %arg3: memref<16x128xf32, #tpu.memory_space<vmem>>) attributes {dimension_semantics = [#tpu.dimension_semantics<parallel>], iteration_bounds = array<i64: 1>, scalar_prefetch = 0 : i64, scratch_operands = 0 : i64, tpu.core_type = #tpu.core_type<tc>, window_params = [{transform_indices = @transform_0, window_bounds = array<i64: 16, 128>}, {pipeline_mode = #tpu.pipeline_mode<synchronous>, transform_indices = @transform_1, window_bounds = array<i64: 128, 128>}, {transform_indices = @transform_2, window_bounds = array<i64: 16, 128>}]} {
    %c0 = arith.constant 0 : index
    %c0_0 = arith.constant 0 : index
    %0 = vector.load %arg1[%c0, %c0_0] : memref<16x128xf32, #tpu.memory_space<vmem>>, vector<16x128xf32>
    %1 = arith.truncf %0 : vector<16x128xf32> to vector<16x128xbf16>
    %c0_1 = arith.constant 0 : index
    %c0_2 = arith.constant 0 : index
    %2 = vector.load %arg2[%c0_1, %c0_2] : memref<128x128xbf16, #tpu.memory_space<vmem>>, vector<128x128xbf16>
    %cst = arith.constant dense<0.000000e+00> : vector<16x128xf32>
    %3 = tpu.matmul %1, %2, %cst {dimension_numbers = #tpu.dot_dimension_numbers<[1], [0], [0], [1], [0, 0, 1, 1], [], []>} : vector<16x128xbf16>, vector<128x128xbf16>, vector<16x128xf32> -> vector<16x128xf32>
    %4 = arith.subf %0, %3 : vector<16x128xf32>
    %c0_3 = arith.constant 0 : index
    %c0_4 = arith.constant 0 : index
    %5 = vector.load %arg3[%c0_3, %c0_4] : memref<16x128xf32, #tpu.memory_space<vmem>>, vector<16x128xf32>
    tpu.vector_store %arg3[%c0_3, %c0_4], %4 {strides = array<i32>} : memref<16x128xf32, #tpu.memory_space<vmem>>, vector<16x128xf32>,
    return
  }
  func.func @transform_0(%arg0: i32) -> (i32, i32) {
    %c0_i32 = arith.constant 0 : i32
    %c0_i32_0 = arith.constant 0 : i32
    return %arg0, %c0_i32 : i32, i32
  }
  func.func @transform_1(%arg0: i32) -> (i32, i32) {
    %c0_i32 = arith.constant 0 : i32
    %c0_i32_0 = arith.constant 0 : i32
    %c0_i32_1 = arith.constant 0 : i32
    return %c0_i32, %c0_i32_0 : i32, i32
  }
  func.func @transform_2(%arg0: i32) -> (i32, i32) {
    %c0_i32 = arith.constant 0 : i32
    %c0_i32_0 = arith.constant 0 : i32
    return %arg0, %c0_i32 : i32, i32
  }
}

</mosaic_0001>

<bundles_post_ra>
// kernel: tpu_custom_call.1
= control target key start
LH: loop header
LB: loop body
LE: loop exit
PB: predicated region body
PF: predicated region fallthrough
CT: control target
= control target key end

     0   :  { %7 = vsyncpa [#allocation3], 0  ;;  %s363_s0 = inlined_call_operand.hbm [shape: f32[16,128], index: 0, kind: input, shape index: {}]   ;;  %s364_s1 = inlined_call_operand.hbm [shape: bf16[128,128], index: 1, kind: input, shape index: {}]   ;;  %s365_s2 = inlined_call_operand.hbm [shape: f32[16,128], index: 2, kind: output, shape index: {}]  }
   0x1   :  { %8 = vsyncpa [#allocation6], 0 }
   0x2   :  { %9 = vsyncpa [#allocation4], 0  ;;  %s297_s9 = smov [#allocation2]   ;;  %s225_s13 = scalar_lea.hbm %s363_s0, 256 }
   0x3   :  { %s15_s10 = sshll.u32 %s297_s9, 4  ;;  %p226_p0 = scmp.ne.s32.totalorder %s363_s0, %s225_s13  ;;  %s16_s10 = int_to_ptr.vmem [resolvable:$true] %s15_s10 }
   0x4   :  { %p229_p1 = scmp.lt.u32.totalorder %s225_s13, %s363_s0 }
   0x6   :  { %p231_p2 = pnand %p229_p1, %p226_p0 }
   0x8   :  { %234 = shalt.err (!%p231_p2)
}
   0x9   :  { %s235_s18 = scalar_lea.vmem %s16_s10, 256  ;;  %p240_p4 = scmp.lt.s32.totalorder %s16_s10, %s16_s10 }
   0xa   :  { %p236_p3 = scmp.ne.s32.totalorder %s16_s10, %s235_s18  ;;  %p241_p5 = scmp.lt.s32.totalorder %s235_s18, %s235_s18 }
   0xc   :  { %p242_p6 = por %p241_p5, %p240_p4 }
   0xe   :  { %p243_p7 = pnand %p242_p6, %p236_p3 }
  0x10   :  { %246 = shalt.err (!%p243_p7)
}
  0x11   :  { %s298_s19 = smov 128   ;;  %s299_s20 = smov 8  }
  0x12   :  { %21 = dma.hbm_to_vmem [thread:$0]  %s363_s0, 256, %s16_s10, [#allocation3], %s298_s19, %s298_s19, %s299_s20  }
  0x13   :  { %s300_s23 = smov [#allocation5]   ;;  %s247_s27 = scalar_lea.hbm %s364_s1, 1024 }
  0x14   :  { %s27_s24 = sshll.u32 %s300_s23, 4  ;;  %p248_p8 = scmp.ne.s32.totalorder %s364_s1, %s247_s27  ;;  %s28_s24 = int_to_ptr.vmem [resolvable:$true] %s27_s24 }
  0x15   :  { %p251_p9 = scmp.lt.u32.totalorder %s247_s27, %s364_s1 }
  0x17   :  { %p253_p10 = pnand %p251_p9, %p248_p8 }
  0x19   :  { %256 = shalt.err (!%p253_p10)
}
  0x1a   :  { %s257_s4 = scalar_lea.vmem %s28_s24, 1024  ;;  %p262_p12 = scmp.lt.s32.totalorder %s28_s24, %s28_s24 }
  0x1b   :  { %p258_p11 = scmp.ne.s32.totalorder %s28_s24, %s257_s4  ;;  %p263_p13 = scmp.lt.s32.totalorder %s257_s4, %s257_s4 }
  0x1d   :  { %p264_p0 = por %p263_p13, %p262_p12 }
  0x1f   :  { %p265_p1 = pnand %p264_p0, %p258_p11 }
  0x21   :  { %268 = shalt.err (!%p265_p1)
}
  0x22   :  { %s301_s0 = smov 64   ;;  %s302_s5 = smov 4  }
  0x23   :  { %33 = dma.hbm_to_vmem [thread:$0]  %s364_s1, 1024, %s28_s24, [#allocation6], %s301_s0, %s301_s0, %s302_s5  }
  0x24   :  { %291 = dma.done.wait [#allocation3], 256  }
  0x25   :  { %292 = vsyncadd [#allocation3], 4294967040 }
  0x26   :  { %293 = dma.done.wait [#allocation6], 1024  }
  0x27   :  { %294 = vsyncadd [#allocation6], 4294966272  ;;  %v303_v0 = vmov 0.0   ;;  %vm304_vm0 = vmmov 0   ;;  %v217_v1 = vld [vmem:[#allocation5] sm:$0xff]   ;;  %v218_v2 = vld [vmem:[#allocation5 + $0x8] sm:$0xff]  }
  0x28   :  { %188 = vmatprep.subr.bf16.mxu0 %v303_v0  ;;  %204 = vmatprep.mubr.msk.bf16.mxu0 %vm304_vm0, %v303_v0  ;;  %v219_v3 = vld [vmem:[#allocation5 + $0x10] sm:$0xff]   ;;  %v220_v4 = vld [vmem:[#allocation5 + $0x18] sm:$0xff]   ;;  %v221_v5 = vld [vmem:[#allocation5 + $0x20] sm:$0xff]   ;;  %s305_s1 = smov [#allocation7]  }
  0x29   :  { %189 = vmatpush3.bf16.msra.mxu0 %v217_v1  ;;  %v222_v6 = vld [vmem:[#allocation5 + $0x28] sm:$0xff]   ;;  %v223_v7 = vld [vmem:[#allocation5 + $0x30] sm:$0xff]   ;;  %v224_v8 = vld [vmem:[#allocation5 + $0x38] sm:$0xff]   ;;  %s158_s8 = sshll.u32 %s305_s1, 4  ;;  %s159_s8 = int_to_ptr.vmem [resolvable:$true] %s158_s8 }
  0x2a   :  { %190 = vmatprep.subr.bf16.mxu0 %v303_v0  ;;  %v41_v9 = vld [vmem:[#allocation2] sm:$0xff]  ;;  %v42_v10 = vld [vmem:[#allocation2 + $0x8] sm:$0xff]  ;;  %s269_s9 = scalar_lea.vmem %s159_s8, 256  ;;  %p274_p3 = scmp.lt.s32.totalorder %s159_s8, %s159_s8 }
  0x2b   :  { %v43_v11 = vpack.c.bf16 %v42_v10, %v41_v9  ;;  %p270_p2 = scmp.ne.s32.totalorder %s159_s8, %s269_s9  ;;  %p275_p4 = scmp.lt.s32.totalorder %s269_s9, %s269_s9 }
  0x2d   :  { %191 = vmatpush3.bf16.msra.mxu0 %v218_v2  ;;  %p276_p5 = por %p275_p4, %p274_p3 }
  0x2e   :  { %192 = vmatprep.subr.bf16.mxu0 %v303_v0 }
  0x2f   :  { %p277_p6 = pnand %p276_p5, %p270_p2 }
  0x31   :  { %193 = vmatpush3.bf16.msra.mxu0 %v219_v3 }
  0x32   :  { %194 = vmatprep.subr.bf16.mxu0 %v303_v0 }
  0x35   :  { %195 = vmatpush3.bf16.msra.mxu0 %v220_v4 }
  0x36   :  { %196 = vmatprep.subr.bf16.mxu0 %v303_v0 }
  0x39   :  { %197 = vmatpush3.bf16.msra.mxu0 %v221_v5 }
  0x3a   :  { %198 = vmatprep.subr.bf16.mxu0 %v303_v0 }
  0x3d   :  { %199 = vmatpush3.bf16.msra.mxu0 %v222_v6 }
  0x3e   :  { %200 = vmatprep.subr.bf16.mxu0 %v303_v0 }
  0x41   :  { %201 = vmatpush3.bf16.msra.mxu0 %v223_v7 }
  0x42   :  { %202 = vmatprep.subr.bf16.mxu0 %v303_v0 }
  0x45   :  { %203 = vmatpush3.bf16.msra.mxu0 %v224_v8 }
  0x48   :  { %205 = vmatmul.mubr.bf16.vlgmr.msra.gmra.mrb[0].mxu0 %v43_v11 }
 0x11b   :  { %v142_v12 = vpop.f32.mrb[0].mxu0 }
 0x11c   :  { %v149_v13 = vsub.f32 %v41_v9, %v142_v12  ;;  %v206_v14 = vpop.f32.mrb[1].mxu0 }
 0x11d   :  { %v145_v15 = vpop.f32.mrb[2].mxu0 }
 0x11e   :  { %151 = vst [vmem:[#allocation7] sm:$0xff] %v149_v13  ;;  %v150_v16 = vsub.f32 %v42_v10, %v145_v15  ;;  %v207_v17 = vpop.f32.mrb[3].mxu0 }
 0x120   :  { %152 = vst [vmem:[#allocation7 + $0x8] sm:$0xff] %v150_v16 }
 0x121   :  { %280 = shalt.err (!%p277_p6)
}
 0x122   :  { %s281_s12 = scalar_lea.hbm %s365_s2, 256 }
 0x123   :  { %p282_p7 = scmp.ne.s32.totalorder %s365_s2, %s281_s12  ;;  %p285_p8 = scmp.lt.u32.totalorder %s281_s12, %s365_s2 }
 0x125   :  { %p287_p9 = pnand %p285_p8, %p282_p7 }
 0x127   :  { %290 = shalt.err (!%p287_p9)
}
 0x128   :  { %164 = dma.vmem_to_hbm [thread:$0]  %s159_s8, 256, %s365_s2, [#allocation4], %s298_s19, %s298_s19, %s299_s20  }
 0x129   :  { %295 = dma.done.wait [#allocation4], 256  }
 0x12a   :  { %296 = vsyncadd [#allocation4], 4294967040 }
 0x12b   :  { %168 = vsyncpa [#allocation3], 1 }
 0x12c   :  { %169 = vsyncpa [#allocation6], 1 }
 0x12d   :  { %170 = vsyncpa [#allocation4], 1 }

</bundles_post_ra>
